<compile_context>
chip_gen: v7x
topology: tpu7x:2x2x1
jax: 0.10.0
libtpu: 0.0.40
codegen_flags: <defaults>
</compile_context>

<pallas_src>
import math
import functools

import jax
import jax.numpy as jnp
from jax import lax
from jax.experimental import pallas as pl
from jax.experimental.pallas import tpu as pltpu


NUM_SPLITS = 2  # leading "parallel" grid axis -> both v7x TensorCores; harmless on v5e/v6e


def _gaussian_hist_kernel(xy_ref, c_ref, out_ref, acc_ref, *, out_scale, compute_dtype):
    # xy_ref : (2, TILE_M) f32 VMEM block  (row 0 = xs', row 1 = ys', pre-scaled)
    # c_ref  : (bins, 1)   f32 VMEM        (centers pre-scaled by sqrt(0.5)/sigma)
    # out_ref: (bins, bins) f32 VMEM block (leading split axis squeezed out)
    # acc_ref: (bins, bins) f32 VMEM scratch accumulator
    k = pl.program_id(1)

    @pl.when(k == 0)
    def _():
        acc_ref[...] = jnp.zeros_like(acc_ref)

    c_col = c_ref[...]                          # (bins, 1)
    xs = xy_ref[0:1, :]                         # (1, TILE_M)
    ys = xy_ref[1:2, :]                         # (1, TILE_M)

    dx = (xs - c_col).astype(compute_dtype)     # (bins, TILE_M), lane-dense
    dy = (ys - c_col).astype(compute_dtype)

    gx = jnp.exp(-(dx * dx))                    # EUP
    gy = jnp.exp(-(dy * dy))

    # acc[i, j] += sum_m gx[i, m] * gy[j, m]  -- one MXU matmul per chunk.
    # TODO(synk): for bins >= 128, compute gy pre-transposed (TILE_M, bins) to skip
    # Mosaic's XLU transpose of the RHS; at small bins (a couple of vregs) it is free.
    acc_ref[...] += lax.dot_general(
        gx, gy,
        dimension_numbers=(((1,), (1,)), ((), ())),
        preferred_element_type=jnp.float32,
    )

    @pl.when(k == pl.num_programs(1) - 1)
    def _():
        # delta / (2*pi*sigma^2) * 100 applied once to the final small tile.
        out_ref[...] = acc_ref[...] * out_scale


def _pick_tile_m(bins, m):
    # Keep the four (bins, TILE_M) f32 intermediates under ~8 MiB so the kernel
    # fits v5e's 16 MiB default scoped VMEM (and trivially v6e 32 MiB / v7x 64 MiB
    # physical) without touching vmem_limit_bytes.  Multiple of 512 keeps every
    # MXU contraction pass full on all generations.
    budget_bytes = 8 * 1024 * 1024
    tile_m = budget_bytes // (4 * bins * 4)
    tile_m = max(512, min(8192, (tile_m // 512) * 512))
    # Don't use a tile far larger than the actual sample count.
    m_rounded = max(512, ((m + 511) // 512) * 512)
    return min(tile_m, m_rounded)


def gaussian_histogram(x, y, *, bins, vmin, vmax, sigma, compute_dtype=jnp.float32):
    """Pallas-backed equivalent of GaussianHistogram(bins, vmin, vmax, sigma)(x, y).

    compute_dtype=jnp.bfloat16 is an optional speed knob for v6e/v7x (bf16 EUP/VPU);
    it introduces ~0.4% relative error, so the default stays float32 (v5e has no
    bf16 vector/EUP path anyway).
    """
    delta = float(vmax - vmin) / float(bins)
    sigma = float(sigma)
    centers = float(vmin) + delta * (jnp.arange(bins, dtype=jnp.float32) + 0.5)

    # Stride-100 subsample: (x[None,:]-c[:,None])[:, ::100] == x[::100][None,:]-c[:,None],
    # so only the surviving M samples enter the kernel.
    xs = x[::100].astype(jnp.float32)
    ys = y[::100].astype(jnp.float32)
    m = int(xs.shape[0])

    tile_m = _pick_tile_m(bins, m)
    chunks_per_split = max(1, -(-m // (NUM_SPLITS * tile_m)))      # ceil div
    m_pad = NUM_SPLITS * chunks_per_split * tile_m

    # Pad the sample (lane) axis with a sigma-relative LARGE distance so padded
    # columns contribute exp(-huge) == 0 exactly (zero padding would add exp(0)==1
    # per padded column).  Offset >= 32*sigma guarantees underflow to 0 in f32/bf16.
    pad_val = float(vmax) + float(vmax - vmin) + 32.0 * sigma + 1.0
    if m_pad > m:
        pad = jnp.full((m_pad - m,), pad_val, dtype=jnp.float32)
        xs = jnp.concatenate([xs, pad])
        ys = jnp.concatenate([ys, pad])

    # Fold 0.5/sigma^2 into the coordinates (wrapper-side scaling touches only
    # M + bins elements, so it is not the usual pre-scale anti-pattern).
    scale_in = math.sqrt(0.5) / sigma
    xy_packed = jnp.stack([xs, ys], axis=0) * scale_in             # (2, Mp)
    c_col = (centers * scale_in).reshape(bins, 1)                  # (bins, 1)

    out_scale = delta / (sigma * sigma * 2.0 * math.pi) * 100.0

    kernel = functools.partial(
        _gaussian_hist_kernel,
        out_scale=out_scale,
        compute_dtype=compute_dtype,
    )

    cost = pl.CostEstimate(
        flops=2 * bins * bins * m_pad + 6 * bins * m_pad,
        transcendentals=2 * bins * m_pad,
        bytes_accessed=4 * (2 * m_pad + bins + NUM_SPLITS * bins * bins),
    )

    grid = (NUM_SPLITS, chunks_per_split)

    partial_hists = pl.pallas_call(
        kernel,
        out_shape=jax.ShapeDtypeStruct((NUM_SPLITS, bins, bins), jnp.float32),
        grid_spec=pltpu.PrefetchScalarGridSpec(
            num_scalar_prefetch=0,
            grid=grid,
            in_specs=[
                # packed xs/ys: one (2, TILE_M) block per (split, chunk)
                pl.BlockSpec((2, tile_m),
                             lambda c, k: (0, c * chunks_per_split + k)),
                # centers column: resident, same block every step
                pl.BlockSpec((bins, 1), lambda c, k: (0, 0)),
            ],
            out_specs=pl.BlockSpec((None, bins, bins), lambda c, k: (c, 0, 0)),
            scratch_shapes=[pltpu.VMEM((bins, bins), jnp.float32)],
        ),
        compiler_params=pltpu.CompilerParams(
            dimension_semantics=("parallel", "arbitrary"),
        ),
        cost_estimate=cost,
    )(xy_packed, c_col)

    # Combine the two TensorCore partials (trivial (bins, bins) add).
    return partial_hists.sum(axis=0)


def _reference(x, y, *, bins, vmin, vmax, sigma):
    """Pure-JAX transcription of the torch forward, for a correctness check."""
    delta = float(vmax - vmin) / float(bins)
    centers = float(vmin) + delta * (jnp.arange(bins, dtype=jnp.float32) + 0.5)
    xd = (x[None, :] - centers[:, None])[:, ::100]
    yd = (y[None, :] - centers[:, None])[:, ::100]
    xy = xd[:, None, :] ** 2 + yd[None, :, :] ** 2
    hist = jnp.exp(-0.5 * xy / sigma ** 2) / (sigma ** 2 * math.pi * 2.0) * delta
    return hist.sum(axis=-1) * 100.0


if __name__ == "__main__":
    # Module hyper-parameters (deterministic, in-script).
    BINS = 16
    VMIN, VMAX = 0.0, 1.0
    SIGMA = 0.1

    # forward(x, y) takes two 1-D sample vectors; the [::100] stride implies N >> 100.
    N = 800  # -> M = 8 samples actually used
    key = jax.random.PRNGKey(0)
    kx, ky = jax.random.split(key)
    x = jax.random.uniform(kx, (N,), dtype=jnp.float32, minval=VMIN, maxval=VMAX)
    y = jax.random.uniform(ky, (N,), dtype=jnp.float32, minval=VMIN, maxval=VMAX)

    out = gaussian_histogram(x, y, bins=BINS, vmin=VMIN, vmax=VMAX, sigma=SIGMA)
    out = jax.block_until_ready(out)

    ref = jax.block_until_ready(
        _reference(x, y, bins=BINS, vmin=VMIN, vmax=VMAX, sigma=SIGMA))
    assert out.shape == (BINS, BINS) and out.dtype == jnp.float32
    if not jnp.allclose(out, ref, rtol=1e-4, atol=1e-4):
        raise AssertionError("Pallas kernel does not match reference")

    print("KERNEL_OK")
</pallas_src>

<mosaic_0001>
module attributes {stable_mosaic.version = 11 : i64} {
  func.func @_gaussian_hist_kernel(%arg0: i32, %arg1: i32, %arg2: memref<2x512xf32, #tpu.memory_space<vmem>>, %arg3: memref<16x1xf32, #tpu.memory_space<vmem>>, %arg4: memref<1x16x16xf32, #tpu.memory_space<vmem>>, %arg5: memref<16x16xf32, #tpu.memory_space<vmem>>) attributes {dimension_semantics = [#tpu.dimension_semantics<parallel>, #tpu.dimension_semantics<arbitrary>], iteration_bounds = array<i64: 2, 1>, scalar_prefetch = 0 : i64, scratch_operands = 1 : i64, tpu.core_type = #tpu.core_type<tc>, window_params = [{transform_indices = @transform_0, window_bounds = array<i64: 2, 512>}, {pipeline_mode = #tpu.pipeline_mode<synchronous>, transform_indices = @transform_1, window_bounds = array<i64: 16, 1>}, {transform_indices = @transform_2, window_bounds = array<i64: 1, 16, 16>}]} {
    %c0_i32 = arith.constant 0 : i32
    %0 = arith.cmpi eq, %arg1, %c0_i32 : i32
    %1 = arith.extui %0 : i1 to i32
    %c0_i32_0 = arith.constant 0 : i32
    %2 = arith.cmpi ne, %1, %c0_i32_0 : i32
    scf.if %2 {
      %cst_13 = arith.constant 0.000000e+00 : f32
      %27 = vector.broadcast %cst_13 : f32 to vector<16x16xf32>
      %c0_14 = arith.constant 0 : index
      %c0_15 = arith.constant 0 : index
      %28 = vector.load %arg5[%c0_14, %c0_15] : memref<16x16xf32, #tpu.memory_space<vmem>>, vector<16x16xf32>
      tpu.vector_store %arg5[%c0_14, %c0_15], %27 {strides = array<i32>} : memref<16x16xf32, #tpu.memory_space<vmem>>, vector<16x16xf32>,
    } else {
    }
    %c0 = arith.constant 0 : index
    %c0_1 = arith.constant 0 : index
    %3 = vector.load %arg3[%c0, %c0_1] : memref<16x1xf32, #tpu.memory_space<vmem>>, vector<16x1xf32>
    %c0_2 = arith.constant 0 : index
    %c0_3 = arith.constant 0 : index
    %4 = vector.load %arg2[%c0_2, %c0_3] : memref<2x512xf32, #tpu.memory_space<vmem>>, vector<1x512xf32>
    %c1 = arith.constant 1 : index
    %c0_4 = arith.constant 0 : index
    %5 = vector.load %arg2[%c1, %c0_4] : memref<2x512xf32, #tpu.memory_space<vmem>>, vector<1x512xf32>
    %6 = vector.broadcast %4 : vector<1x512xf32> to vector<16x512xf32>
    %7 = vector.broadcast %3 : vector<16x1xf32> to vector<16x512xf32>
    %8 = arith.subf %6, %7 : vector<16x512xf32>
    %9 = vector.broadcast %5 : vector<1x512xf32> to vector<16x512xf32>
    %10 = vector.broadcast %3 : vector<16x1xf32> to vector<16x512xf32>
    %11 = arith.subf %9, %10 : vector<16x512xf32>
    %12 = arith.mulf %8, %8 : vector<16x512xf32>
    %cst = arith.constant 0.000000e+00 : f32
    %13 = vector.broadcast %cst : f32 to vector<16x512xf32>
    %14 = arith.subf %13, %12 : vector<16x512xf32>
    %15 = math.exp %14 : vector<16x512xf32>
    %16 = arith.mulf %11, %11 : vector<16x512xf32>
    %cst_5 = arith.constant 0.000000e+00 : f32
    %17 = vector.broadcast %cst_5 : f32 to vector<16x512xf32>
    %18 = arith.subf %17, %16 : vector<16x512xf32>
    %19 = math.exp %18 : vector<16x512xf32>
    %c0_6 = arith.constant 0 : index
    %c0_7 = arith.constant 0 : index
    %20 = vector.load %arg5[%c0_6, %c0_7] : memref<16x16xf32, #tpu.memory_space<vmem>>, vector<16x16xf32>
    %cst_8 = arith.constant dense<0.000000e+00> : vector<16x16xf32>
    %21 = tpu.matmul %15, %19, %cst_8 {dimension_numbers = #tpu.dot_dimension_numbers<[1], [1], [0], [0], [0, 0, 1, 0], [], []>} : vector<16x512xf32>, vector<16x512xf32>, vector<16x16xf32> -> vector<16x16xf32>
    %22 = arith.addf %20, %21 : vector<16x16xf32>
    %c0_9 = arith.constant 0 : index
    %c0_10 = arith.constant 0 : index
    %23 = vector.load %arg5[%c0_9, %c0_10] : memref<16x16xf32, #tpu.memory_space<vmem>>, vector<16x16xf32>
    tpu.vector_store %arg5[%c0_9, %c0_10], %22 {strides = array<i32>} : memref<16x16xf32, #tpu.memory_space<vmem>>, vector<16x16xf32>,
    %c0_i32_11 = arith.constant 0 : i32
    %24 = arith.cmpi eq, %arg1, %c0_i32_11 : i32
    %25 = arith.extui %24 : i1 to i32
    %c0_i32_12 = arith.constant 0 : i32
    %26 = arith.cmpi ne, %25, %c0_i32_12 : i32
    scf.if %26 {
      %c0_13 = arith.constant 0 : index
      %c0_14 = arith.constant 0 : index
      %27 = vector.load %arg5[%c0_13, %c0_14] : memref<16x16xf32, #tpu.memory_space<vmem>>, vector<16x16xf32>
      %cst_15 = arith.constant 99.4718399 : f32
      %28 = vector.broadcast %cst_15 : f32 to vector<16x16xf32>
      %29 = arith.mulf %27, %28 : vector<16x16xf32>
      %c0_16 = arith.constant 0 : index
      %c0_17 = arith.constant 0 : index
      %c0_18 = arith.constant 0 : index
      %30 = vector.load %arg4[%c0_16, %c0_17, %c0_18] : memref<1x16x16xf32, #tpu.memory_space<vmem>>, vector<1x16x16xf32>
      %31 = vector.shape_cast %30 : vector<1x16x16xf32> to vector<16x16xf32>
      %32 = vector.shape_cast %29 : vector<16x16xf32> to vector<1x16x16xf32>
      tpu.vector_store %arg4[%c0_16, %c0_17, %c0_18], %32 {strides = array<i32>} : memref<1x16x16xf32, #tpu.memory_space<vmem>>, vector<1x16x16xf32>,
    } else {
    }
    return
  }
  func.func @transform_0(%arg0: i32, %arg1: i32) -> (i32, i32) {
    %c1_i32 = arith.constant 1 : i32
    %0 = arith.muli %arg0, %c1_i32 : i32
    %1 = arith.addi %0, %arg1 : i32
    %c0_i32 = arith.constant 0 : i32
    %c0_i32_0 = arith.constant 0 : i32
    return %c0_i32, %1 : i32, i32
  }
  func.func @transform_1(%arg0: i32, %arg1: i32) -> (i32, i32) {
    %c0_i32 = arith.constant 0 : i32
    %c0_i32_0 = arith.constant 0 : i32
    %c0_i32_1 = arith.constant 0 : i32
    return %c0_i32, %c0_i32_0 : i32, i32
  }
  func.func @transform_2(%arg0: i32, %arg1: i32) -> (i32, i32, i32) {
    %c0_i32 = arith.constant 0 : i32
    %c0_i32_0 = arith.constant 0 : i32
    %c0_i32_1 = arith.constant 0 : i32
    return %arg0, %c0_i32, %c0_i32_0 : i32, i32, i32
  }
}

</mosaic_0001>

<bundles_post_ra>
// kernel: tpu_custom_call.1
= control target key start
LH: loop header
LB: loop body
LE: loop exit
PB: predicated region body
PF: predicated region fallthrough
CT: control target
= control target key end

     0   :  { %7 = vsyncpa [#allocation4], 0  ;;  %s898_s0 = inlined_call_operand.vmem [shape: f32[2,1024], index: 0, kind: input, shape index: {}]   ;;  %s899_s1 = inlined_call_operand.vmem [shape: f32[16,1], index: 1, kind: input, shape index: {}]   ;;  %s900_s2 = inlined_call_operand.hbm [shape: f32[2,16,16], index: 2, kind: output, shape index: {}]  }
   0x1   :  { %9 = vsyncpa [#allocation4 + $0x1], 0  ;;  %s772_s9 = smov 0   ;;  %s774_s10 = smov 0  }
   0x2   :  { %s776_s11 = smov 0   ;;  %s778_s12 = smov 0  }
   0x3   :  { %s780_s13 = smov 0   ;;  %s782_s14 = smov 0  }
   0x4 LB: > { %s557_s15 = sadd.s32 4294967295, %s750_s14   ;;  %s558_s16 = sadd.s32 4294967294, %s750_s14   ;;  %s750_s14 = sphi %s782_s14, %s15_s14   ;;  %s746_s13 = sphi %s780_s13, %s907_s13   ;;  %s742_s12 = sphi %s778_s12, %s906_s12   ;;  %s738_s11 = sphi %s776_s11, %s905_s11   ;;  %s734_s10 = sphi %s774_s10, %s904_s10   ;;  %s730_s9 = sphi %s772_s9, %s903_s9  }
   0x5   : > { %s27_s17 = sadd.s32 1, %s746_s13  ;;  %s83_s18 = sadd.s32 1, %s738_s11 }
   0x6   : > { %p29_p0 = scmp.ge.s32.totalorder %s27_s17, 2  ;;  %p93_p1 = scmp.ne.s32.totalorder %s738_s11, %s734_s10 }
   0x7   : > { %p94_p2 = scmp.eq.s32.totalorder %s557_s15, 1  ;;  %p99_p3 = scmp.ne.s32.totalorder %s734_s10, %s730_s9 }
   0x8   : > { %s909_s17 = smov (%p29_p0, %s27_s17), 0  ;;  %p100_p5 = scmp.eq.s32.totalorder %s558_s16, 1 }
   0x9   : > { %p812_p4 = por %p94_p2, %p93_p1  ;;  %s80_s20 = ssub.s32 %s746_s13, %s909_s17 }
   0xa   : > { %p561_p6 = scmp.ge.s32.totalorder %s750_s14, 1  ;;  %p81_p7 = scmp.eq.s32.totalorder %s80_s20, 0 }
   0xb   : > { %p819_p8 = por %p100_p5, %p99_p3  ;;  %p132_p9 = scmp.lt.s32.totalorder %s750_s14, 3 }
   0xc   : > { %s825_s22 = scalar_select %p81_p7, %s738_s11, %s83_s18  }
   0xd   : > { %p133_p10 = pnand %p561_p6, %p132_p9 }
   0xe   : > { %v170_v0 = vld [vmem:[%s899_s1] sm:$0xff] (!%p133_p10)  ;;  %v752_v1 = vmov (!%p133_p10), 0   ;;  %v171_v2 = vld [vmem:[%s899_s1 + $0x8] sm:$0xff] (!%p133_p10)  ;;  %s563_s27 = sshll.u32 (!%p133_p10), %s742_s12, 2  ;;  %v176_v3 = vlaneseq (!%p133_p10)  ;;  %vm167_vm0 = vcmask (!%p133_p10), 130048   ;;  %s152_s4 = sand.u32 (!%p133_p10), 1, %s734_s10  }
   0xf   : > { %136 = sbr.rel (%p133_p10) target bundleno = 427 (0x1ab), region = 28  ;;  %639 = vset.pattern.permute.xlu0 (!%p133_p10), %v752_v1  ;;  %p157_p11 = scmp.lt.s32.totalorder (!%p133_p10), %s563_s27, 7 }
  0x10   : > { %198 = vperm.xlu0 (!%p133_p10), %639, %v170_v0   ;;  %v177_v4 = vshrl.u32 (!%p133_p10), %v176_v3, 7  ;;  %s562_s5 = sshll.u32 (!%p133_p10), %s152_s4, 4  ;;  %s571_s6 = sshll.u32 (!%p133_p10), %s742_s12, 8 }
  0x11   : > { %s154_s7 = scalar_lea.vmem (!%p133_p10), [#allocation3], %s562_s5  ;;  %s847_s18 = scalar_lea.hbm (!%p133_p10), %s900_s2, %s571_s6 }
  0x12   : > { %v182_v5 = vsub.s32 (!%p133_p10), 1, %v177_v4  ;;  %v190_v7 = vsub.s32 (!%p133_p10), 3, %v177_v4  ;;  %v178_v10 = vsub.s32 (!%p133_p10), 0, %v177_v4  ;;  %v186_v14 = vsub.s32 (!%p133_p10), 2, %v177_v4  ;;  %s487_s8 = sshll.u32 (!%p133_p10), %s154_s7, 4  ;;  %s852_s20 = scalar_lea.sflag (!%p133_p10), [#allocation4], %s152_s4  ;;  %s849_s8 = int_to_ptr.vmem [resolvable:$true] %s487_s8 }
  0x13   : > { %s672_s12 = scalar_lea.vmem (!%p133_p10), %s849_s8, 256  ;;  %s754_s23 = smov (!%p133_p10), [#allocation3]  }
  0x14   : > { %203 = vperm.xlu0 (!%p133_p10), %639, %v171_v2   ;;  %p673_p12 = scmp.ne.s32.totalorder (!%p133_p10), %s849_s8, %s672_s12  ;;  %s676_s24 = sshll.u32 (!%p133_p10), %s754_s23, 4  ;;  %s677_s24 = int_to_ptr.vmem [resolvable:$false] %s676_s24 }
  0x15   : > { %s678_s25 = scalar_lea.vmem (!%p133_p10), %s677_s24, 512  ;;  %p679_p1 = scmp.lt.s32.totalorder (!%p133_p10), %s849_s8, %s677_s24 }
  0x16   : > { %s911_s27 = smov (!%p157_p11, %s563_s27), 7  ;;  %p674_p13 = pnand %p673_p12, %p812_p4 }
  0x17   : > { %s564_s28 = sshll.u32 %s911_s27, 1  ;;  %p680_p2 = scmp.lt.s32.totalorder %s678_s25, %s672_s12 }
  0x18   : > { %s160_s3 = scalar_lea.vmem %s898_s0, %s564_s28  ;;  %p675_p0 = pneg %p674_p13 }
  0x19   : > { %v172_v6 = vld [vmem:[%s160_s3] ss:$2 sm:$0xf]  ;;  %v565_v8 = vld [vmem:[%s160_s3 + $0x1] ss:$2 sm:$0xf]  ;;  %p681_p3 = por %p680_p2, %p679_p1 }
  0x1a   : > { %v183_v9 = vrot.slane %v172_v6, %v182_v5  ;;  %v222_v11 = vrot.slane %v565_v8, %v182_v5  ;;  %v191_v12 = vrot.slane %v172_v6, %v190_v7  ;;  %v230_v16 = vrot.slane %v565_v8, %v190_v7 }
  0x1b   : > { %v218_v17 = vrot.slane %v565_v8, %v178_v10  ;;  %v226_v22 = vrot.slane %v565_v8, %v186_v14  ;;  %v179_v37 = vrot.slane %v172_v6, %v178_v10  ;;  %v187_v43 = vrot.slane %v172_v6, %v186_v14  ;;  %p682_p5 = pnand %p681_p3, %p675_p0 }
  0x8f   : > { %v199_v13 = vpop.permute.xlu0 %198 }
  0x90   : > { %v207_v15 = vsub.f32 %v183_v9, %v199_v13  ;;  %v236_v18 = vsub.f32 %v222_v11, %v199_v13  ;;  %v209_v19 = vsub.f32 %v191_v12, %v199_v13  ;;  %v238_v23 = vsub.f32 %v230_v16, %v199_v13 }
  0x91   : > { %v235_v28 = vsub.f32 %v218_v17, %v199_v13  ;;  %v237_v30 = vsub.f32 %v226_v22, %v199_v13  ;;  %v206_v47 = vsub.f32 %v179_v37, %v199_v13  ;;  %v208_v57 = vsub.f32 %v187_v43, %v199_v13 }
  0x92   : > { %v244_v20 = vmul.f32 %v207_v15, %v207_v15  ;;  %v246_v24 = vmul.f32 %v209_v19, %v209_v19  ;;  %v276_v27 = vmul.f32 %v236_v18, %v236_v18  ;;  %v278_v33 = vmul.f32 %v238_v23, %v238_v23 }
  0x93   : > { %v204_v21 = vpop.permute.xlu0 %203  ;;  %v275_v36 = vmul.f32 %v235_v28, %v235_v28  ;;  %v277_v40 = vmul.f32 %v237_v30, %v237_v30  ;;  %v243_v60 = vmul.f32 %v206_v47, %v206_v47  ;;  %v245_v6 = vmul.f32 %v208_v57, %v208_v57 }
  0x94   : > { %v240_v25 = vsub.f32 %v222_v11, %v204_v21  ;;  %v252_v26 = vsub.f32 0.0, %v244_v20  ;;  %v242_v31 = vsub.f32 %v230_v16, %v204_v21  ;;  %v254_v32 = vsub.f32 0.0, %v246_v24 }
  0x95   : > { %v284_v35 = vsub.f32 0.0, %v276_v27  ;;  %v286_v42 = vsub.f32 0.0, %v278_v33  ;;  %v239_v45 = vsub.f32 %v218_v17, %v204_v21  ;;  %v283_v46 = vsub.f32 0.0, %v275_v36 }
  0x96   : > { %v261_v29 = vmul.f32 1.442695, %v252_v26  ;;  %v280_v34 = vmul.f32 %v240_v25, %v240_v25  ;;  %v265_v38 = vmul.f32 1.442695, %v254_v32  ;;  %v282_v41 = vmul.f32 %v242_v31, %v242_v31 }
  0x97   : > { %v293_v44 = vmul.f32 1.442695, %v284_v35  ;;  %v241_v50 = vsub.f32 %v226_v22, %v204_v21  ;;  %v297_v51 = vmul.f32 1.442695, %v286_v42  ;;  %v279_v52 = vmul.f32 %v239_v45, %v239_v45 }
  0x98   : > { %640 = vpow2.f32 %v261_v29  ;;  %v288_v39 = vsub.f32 0.0, %v280_v34  ;;  %v290_v49 = vsub.f32 0.0, %v282_v41  ;;  %v285_v53 = vsub.f32 0.0, %v277_v40 }
  0x99   : > { %642 = vpow2.f32 %v265_v38  ;;  %v211_v54 = vsub.f32 %v183_v9, %v204_v21  ;;  %v281_v56 = vmul.f32 %v241_v50, %v241_v50  ;;  %v287_v58 = vsub.f32 0.0, %v279_v52 }
  0x9a   : > { %v301_v48 = vmul.f32 1.442695, %v288_v39  ;;  %v305_v55 = vmul.f32 1.442695, %v290_v49  ;;  %644 = vpow2.f32 %v293_v44  ;;  %v291_v59 = vmul.f32 1.442695, %v283_v46 }
  0x9b   : > { %v213_v61 = vsub.f32 %v191_v12, %v204_v21  ;;  %v289_v62 = vsub.f32 0.0, %v281_v56  ;;  %v210_v63 = vsub.f32 %v179_v37, %v204_v21  ;;  %v299_v0 = vmul.f32 1.442695, %v287_v58 }
  0x9c   : > { %646 = vpow2.f32 %v301_v48  ;;  %v295_v1 = vmul.f32 1.442695, %v285_v53  ;;  %v248_v3 = vmul.f32 %v211_v54, %v211_v54  ;;  %v212_v5 = vsub.f32 %v187_v43, %v204_v21 }
  0x9d   : > { %648 = vpow2.f32 %v297_v51  ;;  %v303_v4 = vmul.f32 1.442695, %v289_v62  ;;  %v250_v7 = vmul.f32 %v213_v61, %v213_v61  ;;  %v247_v8 = vmul.f32 %v210_v63, %v210_v63 }
  0x9e   : > { %650 = vpow2.f32 %v305_v55  ;;  %v251_v9 = vsub.f32 0.0, %v243_v60  ;;  %v256_v10 = vsub.f32 0.0, %v248_v3  ;;  %v249_v12 = vmul.f32 %v212_v5, %v212_v5 }
  0x9f   : > { %652 = vpow2.f32 %v291_v59  ;;  %v253_v13 = vsub.f32 0.0, %v245_v6  ;;  %v258_v14 = vsub.f32 0.0, %v250_v7  ;;  %v255_v16 = vsub.f32 0.0, %v247_v8 }
  0xa0   : > { %654 = vpow2.f32 %v299_v0  ;;  %v259_v17 = vmul.f32 1.442695, %v251_v9  ;;  %v269_v19 = vmul.f32 1.442695, %v256_v10  ;;  %v257_v21 = vsub.f32 0.0, %v249_v12 }
  0xa1   : > { %656 = vpow2.f32 %v295_v1  ;;  %v263_v22 = vmul.f32 1.442695, %v253_v13  ;;  %v273_v25 = vmul.f32 1.442695, %v258_v14  ;;  %v267_v27 = vmul.f32 1.442695, %v255_v16 }
  0xa2   : > { %v641_v2 = vpop.eup %640  ;;  %658 = vpow2.f32 %v303_v4  ;;  %v271_v31 = vmul.f32 1.442695, %v257_v21  ;;  %v753_v41 = vmov 0.0  }
  0xa3   : > { %373 = vmatprep.mubr.f32.mxu0 %v641_v2  ;;  %v643_v11 = vpop.eup %642  ;;  %660 = vpow2.f32 %v259_v17  ;;  %168 = vst.msk [vmem:[#allocation2] sm:$0xff] %vm167_vm0, %v753_v41  ;;  %169 = vst.msk [vmem:[#allocation2 + $0x8] sm:$0xff] %vm167_vm0, %v753_v41 }
  0xa4   : > { %448 = vmatprep.mubr.f32.mxu1 %v643_v11  ;;  %v645_v15 = vpop.eup %644  ;;  %662 = vpow2.f32 %v269_v19 }
  0xa5   : > { %664 = vpow2.f32 %v263_v22 }
  0xa6   : > { %v647_v18 = vpop.eup %646  ;;  %666 = vpow2.f32 %v273_v25 }
  0xa7   : > { %v649_v20 = vpop.eup %648  ;;  %v572_v23 = vpack.c.bf16 %v647_v18, %v645_v15  ;;  %668 = vpow2.f32 %v267_v27 }
  0xa8   : > { %v651_v24 = vpop.eup %650  ;;  %670 = vpow2.f32 %v271_v31 }
  0xa9   : > { %v653_v26 = vpop.eup %652  ;;  %573 = vmatprep.subr.bf16.mxu0 %v572_v23  ;;  %v576_v28 = vpack.c.bf16 %v651_v24, %v649_v20 }
  0xaa   : > { %v655_v29 = vpop.eup %654  ;;  %v307_v44 = vld [vmem:[#allocation2] sm:$0xff]  ;;  %v308_v51 = vld [vmem:[#allocation2 + $0x8] sm:$0xff] }
  0xab   : > { %v657_v30 = vpop.eup %656  ;;  %577 = vmatprep.subr.bf16.mxu1 %v576_v28  ;;  %v574_v32 = vpack.c.bf16 %v655_v29, %v653_v26 }
  0xac   : > { %v659_v33 = vpop.eup %658 }
  0xad   : > { %575 = vmatpush1.bf16.xpose.msra.mxu0 %v574_v32  ;;  %v578_v34 = vpack.c.bf16 %v659_v33, %v657_v30  ;;  %v661_v35 = vpop.eup %660 }
  0xae   : > { %v663_v36 = vpop.eup %662 }
  0xaf   : > { %579 = vmatpush1.bf16.xpose.msra.mxu1 %v578_v34  ;;  %v665_v37 = vpop.eup %664 }
  0xb0   : > { %v667_v38 = vpop.eup %666 }
  0xb1   : > { %v669_v39 = vpop.eup %668 }
  0xb2   : > { %v671_v40 = vpop.eup %670 }
  0xb4   : > { %374 = vmatmul.mubr.f32.vlgmr.msra.gmra.mrb[0].mxu0 %v661_v35 }
  0xb5   : > { %378 = vmatprep.mubr.f32.mxu0 %v663_v36 }
  0xb6   : > { %449 = vmatmul.mubr.f32.vlgmr.msra.gmra.mrb[0].mxu1 %v665_v37 }
  0xb7   : > { %453 = vmatprep.mubr.f32.mxu1 %v667_v38 }
  0xb8   : > { %379 = vmatmul.mubr.f32.gmra.mrb[2].mxu0 %v669_v39 }
  0xba   : > { %454 = vmatmul.mubr.f32.gmra.mrb[2].mxu1 %v671_v40 }
 0x187   : > { %v375_v42 = vpop.f32.mrb[0].mxu0 }
 0x188   : > { %v377_v43 = vpop.f32.mrb[1].mxu0 }
 0x189   : > { %v450_v45 = vpop.f32.mrb[0].mxu1 }
 0x18a   : > { %v451_v46 = vadd.f32 %v450_v45, %v375_v42  ;;  %v452_v47 = vpop.f32.mrb[1].mxu1 }
 0x18b   : > { %v380_v48 = vpop.f32.mrb[2].mxu0 }
 0x18c   : > { %v459_v49 = vadd.f32 %v451_v46, %v307_v44  ;;  %v382_v50 = vpop.f32.mrb[3].mxu0 }
 0x18d   : > { %v455_v52 = vpop.f32.mrb[2].mxu1 }
 0x18e   : > { %462 = vst.msk [vmem:[#allocation2] sm:$0xff] %vm167_vm0, %v459_v49  ;;  %v456_v53 = vadd.f32 %v455_v52, %v380_v48  ;;  %v457_v54 = vpop.f32.mrb[3].mxu1 }
 0x190   : > { %v460_v55 = vadd.f32 %v456_v53, %v308_v51 }
 0x192   : > { %463 = vst.msk [vmem:[#allocation2 + $0x8] sm:$0xff] %vm167_vm0, %v460_v55 }
 0x195   : > { %v467_v56 = vld [vmem:[#allocation2] sm:$0xff] }
 0x196   : > { %v469_v57 = vmul.f32 99.47184, %v467_v56 }
 0x198   : > { %471 = vst.msk [vmem:[%s154_s7] sm:$0xff] %vm167_vm0, %v469_v57 }
 0x199   : > { %v468_v58 = vld [vmem:[#allocation2 + $0x8] sm:$0xff] }
 0x19a   : > { %v470_v59 = vmul.f32 99.47184, %v468_v58 }
 0x19c   : > { %472 = vst.msk [vmem:[%s154_s7 + $0x8] sm:$0xff] %vm167_vm0, %v470_v59 }
 0x19d   : > { %685 = shalt.err (!%p682_p5)
}
 0x19e   : > { %s686_s26 = scalar_lea.hbm %s847_s18, 256  ;;  %s690_s29 = scalar_lea.hbm %s900_s2, 512 }
 0x19f   : > { %p687_p6 = scmp.ne.s32.totalorder %s847_s18, %s686_s26  ;;  %p691_p10 = scmp.lt.u32.totalorder %s847_s18, %s900_s2 }
 0x1a0   : > { %p692_p11 = scmp.lt.u32.totalorder %s690_s29, %s686_s26  ;;  %p694_p13 = scmp.lt.u32.totalorder %s686_s26, %s847_s18 }
 0x1a1   : > { %p688_p7 = pnand %p687_p6, %p812_p4 }
 0x1a2   : > { %p693_p12 = por %p692_p11, %p691_p10 }
 0x1a3   : > { %p689_p9 = pneg %p688_p7 }
 0x1a4   : > { %p695_p0 = por %p694_p13, %p693_p12 }
 0x1a6   : > { %p696_p1 = pnand %p695_p0, %p689_p9 }
 0x1a8   : > { %699 = shalt.err (!%p696_p1)
}
 0x1a9   : > { %s755_s4 = smov 128   ;;  %s756_s5 = smov 8  }
 0x1aa   : > { %580 = dma.vmem_to_hbm [thread:$0]  (%p812_p4), %s849_s8, 256, %s847_s18, %s852_s20, %s755_s4, %s755_s4, %s756_s5  }
 0x1ab PF: > { %p586_p2 = scmp.ge.s32.totalorder %s750_s14, 2  ;;  %s502_s6 = sand.u32 1, %s730_s9  }
 0x1ac   : > { %s503_s7 = scalar_lea.sflag [#allocation4], %s502_s6 }
 0x1ad   : > { %p583_p3 = pnand %p586_p2, %p819_p8 }
 0x1af   : > { %725 = dma.done.wait (!%p583_p3), %s503_s7, 256  }
 0x1b0   : > { %727 = vsyncadd (!%p583_p3), %s503_s7, 4294967040  ;;  %s15_s14 = sadd.s32 1, %s750_s14   ;;  %s903_s9 = smov %s734_s10 }
 0x1b1   : > { %p12_p5 = scmp.ge.s32.totalorder %s15_s14, 4   ;;  %s904_s10 = smov %s738_s11 }
 0x1b2   : > { %s905_s11 = smov %s825_s22  ;;  %s906_s12 = smov %s746_s13 }
 0x1b3   : > { %s907_s13 = smov %s909_s17  ;;  %14 = sbr.rel (!%p12_p5) target bundleno = 4 (0x4), region = 72 }
 0x1ba   :  { %508 = vsyncpa [#allocation4], 1 }
 0x1bb   :  { %510 = vsyncpa [#allocation4 + $0x1], 1 }

</bundles_post_ra>
